<compile_context>
chip_gen: v6e
topology: v6e:2x2x1
jax: 0.10.0
libtpu: 0.0.40
codegen_flags: <defaults>
</compile_context>

<pallas_src>
import jax
import jax.numpy as jnp
from jax.experimental import pallas as pl
from jax.experimental.pallas import tpu as pltpu

HIDDEN = 128          # first Linear's output width (fixed by the module)
NEG_SLOPE = 0.01      # PyTorch LeakyReLU default negative_slope


def _round_up(n, m):
    return ((n + m - 1) // m) * m


def _choose_tb(batch, d, block_b):
    """Pick the batch tile size (rows per grid step)."""
    if batch <= 128:
        return batch                    # one full-batch tile (block == full dim)
    x_bytes = 4                          # x streamed as f32, cast in-kernel
    # Keep the double-buffered f32 x tiles within ~40 MiB of VMEM
    # (v7x: 64 MiB physical, 32 MiB scoped default; limit raised below).
    vmem_cap = max(128, ((40 << 20) // (2 * d * x_bytes)) // 128 * 128)
    tb = min(block_b, vmem_cap)
    # v7x megacore: keep >= 2 grid steps so both TensorCores (and both DMA
    # engines) pull tiles of the "parallel" batch axis.
    tb = min(tb, _round_up(-(-batch // 2), 128))
    # Tile-size floor: ~0.35 us per grid step makes 128-row tiles ~3x slower
    # than 512+ row tiles on this mem-bound kernel; never exceed the VMEM cap.
    floor = 512 if batch >= 1024 else 128
    tb = max(tb, min(floor, vmem_cap))
    return tb


def _disc_kernel(x_ref, w1_ref, b1_ref, w2_ref, b2_ref, o_ref):
    # ---- Linear 1 on the MXU: cast the f32 x tile to bf16 in-register (the HBM
    #      stream stays f32 -> no wrapper-side convert pass), f32 accumulate.
    x_bf16 = x_ref[...].astype(jnp.bfloat16)
    h = jnp.dot(x_bf16, w1_ref[...], preferred_element_type=jnp.float32)
    h = h + b1_ref[...]                              # (1, 128) f32 bias broadcast
    # ---- LeakyReLU (negative_slope = 0.01) on the VPU
    h = jnp.where(h > 0, h, NEG_SLOPE * h)
    # ---- Linear 2 (128 -> 1): VPU multiply + lane reduction instead of an N=1
    #      MXU matmul (which would waste most of the systolic array).
    z = jnp.sum(h * w2_ref[...], axis=-1, keepdims=True) + b2_ref[0, 0]
    # ---- Sigmoid: exp on the EUP; exact reciprocal for parity with torch.
    o_ref[...] = pl.reciprocal(1.0 + jnp.exp(-z), approx=False).astype(o_ref.dtype)


def discriminator_forward(x, w1, b1, w2, b2, *, block_b=1024):
    """Linear(D,128) -> LeakyReLU(0.01) -> Linear(128,1) -> Sigmoid.

    x:  [B, D] float32 (bf16 also accepted)
    w1: [D, 128], b1: [1, 128], w2: [128, 1], b2: [1, 1]  (float32)
    Returns [B, 1] float32.
    """
    B, D = x.shape
    assert w1.shape == (D, HIDDEN)
    assert b1.shape == (1, HIDDEN)
    assert w2.shape == (HIDDEN, 1)
    assert b2.shape == (1, 1)

    tb = _choose_tb(B, D, block_b)
    num_tiles = pl.cdiv(B, tb)
    x_bytes = x.dtype.itemsize

    # Weights are tiny: a one-time bf16 cast of w1 halves its VMEM footprint.
    # x itself is NOT cast or padded in the wrapper (dominant HBM stream).
    w1_bf16 = w1.astype(jnp.bfloat16)
    w2_row = w2.reshape(1, HIDDEN).astype(jnp.float32)

    # Explicit scoped-VMEM limit: double-buffered x tiles + weights + headroom,
    # clamped to 48 MiB (inside v7x's 64 MiB physical; above v5e's 16 MiB and
    # v6e's 32 MiB scoped defaults, well under their 128 MiB physical).
    est_vmem = (2 * tb * D * x_bytes          # double-buffered x tiles
                + 2 * tb * 4                  # double-buffered (tb, 1) output
                + D * HIDDEN * 2              # bf16 w1 (single buffer)
                + 2 * HIDDEN * 4              # b1 + w2 rows
                + 2 * tb * HIDDEN * 4         # headroom for the f32 h intermediate
                + (4 << 20))
    vmem_limit = int(min(max(est_vmem, 32 << 20), 48 << 20))

    cost = pl.CostEstimate(
        flops=2 * B * D * HIDDEN + 4 * B * HIDDEN,
        transcendentals=2 * B,
        bytes_accessed=B * D * x_bytes + D * HIDDEN * 2 + HIDDEN * 12 + B * 4,
    )

    def _build(single_buffer_weights):
        wkw = ({"pipeline_mode": pl.Buffered(1)}
               if single_buffer_weights and hasattr(pl, "Buffered") else {})
        return pl.pallas_call(
            _disc_kernel,
            out_shape=jax.ShapeDtypeStruct((B, 1), jnp.float32),
            grid=(num_tiles,),
            in_specs=[
                # x: one batch tile per grid step, auto double-buffered; the last
                # block may be partial -- Pallas masks out-of-range output rows.
                pl.BlockSpec((tb, D), lambda i: (i, 0)),
                # Weights / biases: constant index_map -> VMEM-resident; request
                # a single buffer (the block never changes across the grid).
                pl.BlockSpec((D, HIDDEN), lambda i: (0, 0), **wkw),
                pl.BlockSpec((1, HIDDEN), lambda i: (0, 0), **wkw),
                pl.BlockSpec((1, HIDDEN), lambda i: (0, 0), **wkw),
                # Single scalar bias lives in SMEM.
                pl.BlockSpec(memory_space=pltpu.MemorySpace.SMEM),
            ],
            out_specs=pl.BlockSpec((tb, 1), lambda i: (i, 0)),
            compiler_params=pltpu.CompilerParams(
                # Batch tiles are independent -> shard across TensorCores (v7x).
                dimension_semantics=("parallel",),
                vmem_limit_bytes=vmem_limit,
            ),
            cost_estimate=cost,
        )

    try:
        return _build(True)(x, w1_bf16, b1, w2_row, b2)
    except Exception:
        # Fallback if Buffered(1) pipeline mode is unsupported on this jax build.
        return _build(False)(x, w1_bf16, b1, w2_row, b2)


def init_params(key, input_size):
    """Deterministic init mimicking PyTorch's nn.Linear default:
    U(-1/sqrt(fan_in), 1/sqrt(fan_in)) for both weights and biases."""
    k1, k2, k3, k4 = jax.random.split(key, 4)
    bound1 = 1.0 / jnp.sqrt(jnp.float32(input_size))
    bound2 = 1.0 / jnp.sqrt(jnp.float32(HIDDEN))
    w1 = jax.random.uniform(k1, (input_size, HIDDEN), jnp.float32, -bound1, bound1)
    b1 = jax.random.uniform(k2, (1, HIDDEN), jnp.float32, -bound1, bound1)
    w2 = jax.random.uniform(k3, (HIDDEN, 1), jnp.float32, -bound2, bound2)
    b2 = jax.random.uniform(k4, (1, 1), jnp.float32, -bound2, bound2)
    return w1, b1, w2, b2


def _reference(x, w1, b1, w2, b2):
    h = x @ w1 + b1
    h = jnp.where(h > 0, h, NEG_SLOPE * h)
    return jax.nn.sigmoid(h @ w2 + b2)


if __name__ == "__main__":
    key = jax.random.PRNGKey(0)
    k_x, k_p, k_x2, k_p2 = jax.random.split(key, 4)

    # Case 1: small shapes consistent with Discriminator(input_size=64), batch=8.
    B, D = 8, 64
    x = jax.random.normal(k_x, (B, D), jnp.float32)
    params = init_params(k_p, D)
    out = jax.block_until_ready(discriminator_forward(x, *params))
    ref = _reference(x, *params)
    assert out.shape == (B, 1)
    assert jnp.allclose(out, ref, atol=2e-2, rtol=2e-2), \
        float(jnp.max(jnp.abs(out - ref)))

    # Case 2: multi-tile grid with a partial last block (no wrapper-side pad).
    B2, D2 = 300, 96
    x2 = jax.random.normal(k_x2, (B2, D2), jnp.float32)
    params2 = init_params(k_p2, D2)
    out2 = jax.block_until_ready(discriminator_forward(x2, *params2, block_b=128))
    ref2 = _reference(x2, *params2)
    assert out2.shape == (B2, 1)
    assert jnp.allclose(out2, ref2, atol=2e-2, rtol=2e-2), \
        float(jnp.max(jnp.abs(out2 - ref2)))

    print("KERNEL_OK")
</pallas_src>

<mosaic_0001>
module attributes {stable_mosaic.version = 11 : i64} {
  func.func @_disc_kernel(%arg0: i32, %arg1: memref<8x64xf32, #tpu.memory_space<vmem>>, %arg2: memref<64x128xbf16, #tpu.memory_space<vmem>>, %arg3: memref<1x128xf32, #tpu.memory_space<vmem>>, %arg4: memref<1x128xf32, #tpu.memory_space<vmem>>, %arg5: memref<1x1xf32, #tpu.memory_space<smem>>, %arg6: memref<8x1xf32, #tpu.memory_space<vmem>>) attributes {dimension_semantics = [#tpu.dimension_semantics<parallel>], iteration_bounds = array<i64: 1>, scalar_prefetch = 0 : i64, scratch_operands = 0 : i64, tpu.core_type = #tpu.core_type<tc>, window_params = [{transform_indices = @transform_0, window_bounds = array<i64: 8, 64>}, {pipeline_mode = #tpu.pipeline_mode<synchronous>, transform_indices = @transform_1, window_bounds = array<i64: 64, 128>}, {pipeline_mode = #tpu.pipeline_mode<synchronous>, transform_indices = @transform_2, window_bounds = array<i64: 1, 128>}, {pipeline_mode = #tpu.pipeline_mode<synchronous>, transform_indices = @transform_3, window_bounds = array<i64: 1, 128>}, {transform_indices = @transform_4, window_bounds = array<i64: 1, 1>}, {transform_indices = @transform_5, window_bounds = array<i64: 8, 1>}]} {
    %c0 = arith.constant 0 : index
    %c0_0 = arith.constant 0 : index
    %0 = vector.load %arg1[%c0, %c0_0] : memref<8x64xf32, #tpu.memory_space<vmem>>, vector<8x64xf32>
    %1 = arith.truncf %0 : vector<8x64xf32> to vector<8x64xbf16>
    %c0_1 = arith.constant 0 : index
    %c0_2 = arith.constant 0 : index
    %2 = vector.load %arg2[%c0_1, %c0_2] : memref<64x128xbf16, #tpu.memory_space<vmem>>, vector<64x128xbf16>
    %cst = arith.constant dense<0.000000e+00> : vector<8x128xf32>
    %3 = tpu.matmul %1, %2, %cst {dimension_numbers = #tpu.dot_dimension_numbers<[1], [0], [0], [1], [0, 0, 1, 1], [], []>} : vector<8x64xbf16>, vector<64x128xbf16>, vector<8x128xf32> -> vector<8x128xf32>
    %c0_3 = arith.constant 0 : index
    %c0_4 = arith.constant 0 : index
    %4 = vector.load %arg3[%c0_3, %c0_4] : memref<1x128xf32, #tpu.memory_space<vmem>>, vector<1x128xf32>
    %5 = vector.broadcast %4 : vector<1x128xf32> to vector<8x128xf32>
    %6 = arith.addf %3, %5 : vector<8x128xf32>
    %cst_5 = arith.constant 0.000000e+00 : f32
    %7 = vector.broadcast %cst_5 : f32 to vector<8x128xf32>
    %8 = arith.cmpf ogt, %6, %7 : vector<8x128xf32>
    %cst_6 = arith.constant 0.00999999977 : f32
    %9 = vector.broadcast %cst_6 : f32 to vector<8x128xf32>
    %10 = arith.mulf %9, %6 : vector<8x128xf32>
    %11 = arith.select %8, %6, %10 : vector<8x128xi1>, vector<8x128xf32>
    %c0_7 = arith.constant 0 : index
    %c0_8 = arith.constant 0 : index
    %12 = vector.load %arg4[%c0_7, %c0_8] : memref<1x128xf32, #tpu.memory_space<vmem>>, vector<1x128xf32>
    %13 = vector.broadcast %12 : vector<1x128xf32> to vector<8x128xf32>
    %14 = arith.mulf %11, %13 : vector<8x128xf32>
    %cst_9 = arith.constant dense<0.000000e+00> : vector<8xf32>
    %15 = vector.multi_reduction <add>, %14, %cst_9 [1] : vector<8x128xf32> to vector<8xf32>
    %16 = vector.shape_cast %15 : vector<8xf32> to vector<8x1xf32>
    %c0_10 = arith.constant 0 : index
    %c0_11 = arith.constant 0 : index
    %17 = memref.load %arg5[%c0_10, %c0_11] : memref<1x1xf32, #tpu.memory_space<smem>>
    %18 = vector.broadcast %17 : f32 to vector<8x1xf32>
    %19 = arith.addf %16, %18 : vector<8x1xf32>
    %cst_12 = arith.constant 0.000000e+00 : f32
    %20 = vector.broadcast %cst_12 : f32 to vector<8x1xf32>
    %21 = arith.subf %20, %19 : vector<8x1xf32>
    %22 = math.exp %21 : vector<8x1xf32>
    %cst_13 = arith.constant 1.000000e+00 : f32
    %23 = vector.broadcast %cst_13 : f32 to vector<8x1xf32>
    %24 = arith.addf %23, %22 : vector<8x1xf32>
    %25 = tpu.reciprocal %24 : vector<8x1xf32> -> vector<8x1xf32>
    %c0_14 = arith.constant 0 : index
    %c0_15 = arith.constant 0 : index
    %26 = vector.load %arg6[%c0_14, %c0_15] : memref<8x1xf32, #tpu.memory_space<vmem>>, vector<8x1xf32>
    tpu.vector_store %arg6[%c0_14, %c0_15], %25 {strides = array<i32>} : memref<8x1xf32, #tpu.memory_space<vmem>>, vector<8x1xf32>,
    return
  }
  func.func @transform_0(%arg0: i32) -> (i32, i32) {
    %c0_i32 = arith.constant 0 : i32
    %c0_i32_0 = arith.constant 0 : i32
    return %arg0, %c0_i32 : i32, i32
  }
  func.func @transform_1(%arg0: i32) -> (i32, i32) {
    %c0_i32 = arith.constant 0 : i32
    %c0_i32_0 = arith.constant 0 : i32
    %c0_i32_1 = arith.constant 0 : i32
    return %c0_i32, %c0_i32_0 : i32, i32
  }
  func.func @transform_2(%arg0: i32) -> (i32, i32) {
    %c0_i32 = arith.constant 0 : i32
    %c0_i32_0 = arith.constant 0 : i32
    %c0_i32_1 = arith.constant 0 : i32
    return %c0_i32, %c0_i32_0 : i32, i32
  }
  func.func @transform_3(%arg0: i32) -> (i32, i32) {
    %c0_i32 = arith.constant 0 : i32
    %c0_i32_0 = arith.constant 0 : i32
    %c0_i32_1 = arith.constant 0 : i32
    return %c0_i32, %c0_i32_0 : i32, i32
  }
  func.func @transform_4(%arg0: i32) -> (i32, i32) {
    %c0_i32 = arith.constant 0 : i32
    %c0_i32_0 = arith.constant 0 : i32
    %c0_i32_1 = arith.constant 0 : i32
    return %c0_i32, %c0_i32_0 : i32, i32
  }
  func.func @transform_5(%arg0: i32) -> (i32, i32) {
    %c0_i32 = arith.constant 0 : i32
    %c0_i32_0 = arith.constant 0 : i32
    return %arg0, %c0_i32 : i32, i32
  }
}

module attributes {stable_mosaic.version = 11 : i64} {
  func.func @_disc_kernel(%arg0: i32, %arg1: memref<8x64xf32, #tpu.memory_space<vmem>>, %arg2: memref<64x128xbf16, #tpu.memory_space<vmem>>, %arg3: memref<1x128xf32, #tpu.memory_space<vmem>>, %arg4: memref<1x128xf32, #tpu.memory_space<vmem>>, %arg5: memref<1x1xf32, #tpu.memory_space<smem>>, %arg6: memref<8x1xf32, #tpu.memory_space<vmem>>) attributes {dimension_semantics = [#tpu.dimension_semantics<parallel>], iteration_bounds = array<i64: 1>, scalar_prefetch = 0 : i64, scratch_operands = 0 : i64, tpu.core_type = #tpu.core_type<tc>, window_params = [{transform_indices = @transform_0, window_bounds = array<i64: 8, 64>}, {pipeline_mode = #tpu.pipeline_mode<synchronous>, transform_indices = @transform_1, window_bounds = array<i64: 64, 128>}, {pipeline_mode = #tpu.pipeline_mode<synchronous>, transform_indices = @transform_2, window_bounds = array<i64: 1, 128>}, {pipeline_mode = #tpu.pipeline_mode<synchronous>, transform_indices = @transform_3, window_bounds = array<i64: 1, 128>}, {transform_indices = @transform_4, window_bounds = array<i64: 1, 1>}, {transform_indices = @transform_5, window_bounds = array<i64: 8, 1>}]} {
    %c0 = arith.constant 0 : index
    %c0_0 = arith.constant 0 : index
    %0 = vector.load %arg1[%c0, %c0_0] : memref<8x64xf32, #tpu.memory_space<vmem>>, vector<8x64xf32>
    %1 = arith.truncf %0 : vector<8x64xf32> to vector<8x64xbf16>
    %c0_1 = arith.constant 0 : index
    %c0_2 = arith.constant 0 : index
    %2 = vector.load %arg2[%c0_1, %c0_2] : memref<64x128xbf16, #tpu.memory_space<vmem>>, vector<64x128xbf16>
    %cst = arith.constant dense<0.000000e+00> : vector<8x128xf32>
    %3 = tpu.matmul %1, %2, %cst {dimension_numbers = #tpu.dot_dimension_numbers<[1], [0], [0], [1], [0, 0, 1, 1], [], []>} : vector<8x64xbf16>, vector<64x128xbf16>, vector<8x128xf32> -> vector<8x128xf32>
    %c0_3 = arith.constant 0 : index
    %c0_4 = arith.constant 0 : index
    %4 = vector.load %arg3[%c0_3, %c0_4] : memref<1x128xf32, #tpu.memory_space<vmem>>, vector<1x128xf32>
    %5 = vector.broadcast %4 : vector<1x128xf32> to vector<8x128xf32>
    %6 = arith.addf %3, %5 : vector<8x128xf32>
    %cst_5 = arith.constant 0.000000e+00 : f32
    %7 = vector.broadcast %cst_5 : f32 to vector<8x128xf32>
    %8 = arith.cmpf ogt, %6, %7 : vector<8x128xf32>
    %cst_6 = arith.constant 0.00999999977 : f32
    %9 = vector.broadcast %cst_6 : f32 to vector<8x128xf32>
    %10 = arith.mulf %9, %6 : vector<8x128xf32>
    %11 = arith.select %8, %6, %10 : vector<8x128xi1>, vector<8x128xf32>
    %c0_7 = arith.constant 0 : index
    %c0_8 = arith.constant 0 : index
    %12 = vector.load %arg4[%c0_7, %c0_8] : memref<1x128xf32, #tpu.memory_space<vmem>>, vector<1x128xf32>
    %13 = vector.broadcast %12 : vector<1x128xf32> to vector<8x128xf32>
    %14 = arith.mulf %11, %13 : vector<8x128xf32>
    %cst_9 = arith.constant dense<0.000000e+00> : vector<8xf32>
    %15 = vector.multi_reduction <add>, %14, %cst_9 [1] : vector<8x128xf32> to vector<8xf32>
    %16 = vector.shape_cast %15 : vector<8xf32> to vector<8x1xf32>
    %c0_10 = arith.constant 0 : index
    %c0_11 = arith.constant 0 : index
    %17 = memref.load %arg5[%c0_10, %c0_11] : memref<1x1xf32, #tpu.memory_space<smem>>
    %18 = vector.broadcast %17 : f32 to vector<8x1xf32>
    %19 = arith.addf %16, %18 : vector<8x1xf32>
    %cst_12 = arith.constant 0.000000e+00 : f32
    %20 = vector.broadcast %cst_12 : f32 to vector<8x1xf32>
    %21 = arith.subf %20, %19 : vector<8x1xf32>
    %22 = math.exp %21 : vector<8x1xf32>
    %cst_13 = arith.constant 1.000000e+00 : f32
    %23 = vector.broadcast %cst_13 : f32 to vector<8x1xf32>
    %24 = arith.addf %23, %22 : vector<8x1xf32>
    %25 = tpu.reciprocal %24 : vector<8x1xf32> -> vector<8x1xf32>
    %c0_14 = arith.constant 0 : index
    %c0_15 = arith.constant 0 : index
    %26 = vector.load %arg6[%c0_14, %c0_15] : memref<8x1xf32, #tpu.memory_space<vmem>>, vector<8x1xf32>
    tpu.vector_store %arg6[%c0_14, %c0_15], %25 {strides = array<i32>} : memref<8x1xf32, #tpu.memory_space<vmem>>, vector<8x1xf32>,
    return
  }
  func.func @transform_0(%arg0: i32) -> (i32, i32) {
    %c0_i32 = arith.constant 0 : i32
    %c0_i32_0 = arith.constant 0 : i32
    return %arg0, %c0_i32 : i32, i32
  }
  func.func @transform_1(%arg0: i32) -> (i32, i32) {
    %c0_i32 = arith.constant 0 : i32
    %c0_i32_0 = arith.constant 0 : i32
    %c0_i32_1 = arith.constant 0 : i32
    return %c0_i32, %c0_i32_0 : i32, i32
  }
  func.func @transform_2(%arg0: i32) -> (i32, i32) {
    %c0_i32 = arith.constant 0 : i32
    %c0_i32_0 = arith.constant 0 : i32
    %c0_i32_1 = arith.constant 0 : i32
    return %c0_i32, %c0_i32_0 : i32, i32
  }
  func.func @transform_3(%arg0: i32) -> (i32, i32) {
    %c0_i32 = arith.constant 0 : i32
    %c0_i32_0 = arith.constant 0 : i32
    %c0_i32_1 = arith.constant 0 : i32
    return %c0_i32, %c0_i32_0 : i32, i32
  }
  func.func @transform_4(%arg0: i32) -> (i32, i32) {
    %c0_i32 = arith.constant 0 : i32
    %c0_i32_0 = arith.constant 0 : i32
    %c0_i32_1 = arith.constant 0 : i32
    return %c0_i32, %c0_i32_0 : i32, i32
  }
  func.func @transform_5(%arg0: i32) -> (i32, i32) {
    %c0_i32 = arith.constant 0 : i32
    %c0_i32_0 = arith.constant 0 : i32
    return %arg0, %c0_i32 : i32, i32
  }
}

</mosaic_0001>

<bundles_post_ra>
// kernel: tpu_custom_call.1
= control target key start
LH: loop header
LB: loop body
LE: loop exit
PB: predicated region body
PF: predicated region fallthrough
CT: control target
= control target key end

     0   :  { %11 = vsyncpa [#allocation4], 0  ;;  %s298_s0 = inlined_call_operand.hbm [shape: f32[8,64], index: 0, kind: input, shape index: {}]   ;;  %s299_s1 = inlined_call_operand.hbm [shape: bf16[64,128], index: 1, kind: input, shape index: {}]   ;;  %s300_s2 = inlined_call_operand.vmem [shape: f32[1,128], index: 2, kind: input, shape index: {}]   ;;  %s301_s3 = inlined_call_operand.vmem [shape: f32[1,128], index: 3, kind: input, shape index: {}]   ;;  %s302_s4 = inlined_call_operand.<no memory space> [shape: f32[1,1], index: 4, kind: input, shape index: {}]   ;;  %s303_s5 = inlined_call_operand.vmem [shape: f32[8,1], index: 5, kind: output, shape index: {}]  }
   0x1   :  { %12 = vsyncpa [#allocation6], 0  ;;  %s244_s18 = smov [#allocation3]   ;;  %s245_s20 = smov [#allocation5]  }
   0x2   :  { %s19_s19 = sshll.u32 %s244_s18, 4  ;;  %s28_s21 = sshll.u32 %s245_s20, 4  ;;  %s20_s19 = int_to_ptr.vmem [resolvable:$true] %s19_s19  ;;  %s29_s21 = int_to_ptr.vmem [resolvable:$true] %s28_s21 }
   0x3   :  { %s208_s22 = scalar_lea.vmem %s20_s19, 128  ;;  %p213_p1 = scmp.lt.s32.totalorder %s20_s19, %s20_s19 }
   0x4   :  { %p209_p0 = scmp.ne.s32.totalorder %s20_s19, %s208_s22  ;;  %p214_p2 = scmp.lt.s32.totalorder %s208_s22, %s208_s22 }
   0x6   :  { %p215_p3 = por %p214_p2, %p213_p1 }
   0x8   :  { %p216_p4 = pnand %p215_p3, %p209_p0 }
   0xa   :  { %219 = shalt.err (!%p216_p4)
}
   0xb   :  { %22 = dma.hbm_to_vmem [thread:$0]  %s298_s0, 128, %s20_s19, [#allocation4]  }
   0xc   :  { %s228_s25 = scalar_lea.vmem %s29_s21, 512  ;;  %p233_p6 = scmp.lt.s32.totalorder %s29_s21, %s29_s21 }
   0xd   :  { %p229_p5 = scmp.ne.s32.totalorder %s29_s21, %s228_s25  ;;  %p234_p7 = scmp.lt.s32.totalorder %s228_s25, %s228_s25 }
   0xf   :  { %p235_p8 = por %p234_p7, %p233_p6 }
  0x11   :  { %p236_p9 = pnand %p235_p8, %p229_p5 }
  0x13   :  { %239 = shalt.err (!%p236_p9)
}
  0x14   :  { %s246_s26 = smov 64   ;;  %s247_s27 = smov 4  }
  0x15   :  { %34 = dma.hbm_to_vmem [thread:$0]  %s299_s1, 512, %s29_s21, [#allocation6], %s246_s26, %s246_s26, %s247_s27  }
  0x16   :  { %240 = dma.done.wait [#allocation4], 128  }
  0x17   :  { %241 = vsyncadd [#allocation4], 4294967168 }
  0x18   :  { %242 = dma.done.wait [#allocation6], 512  }
  0x19   :  { %243 = vsyncadd [#allocation6], 4294966784  ;;  %v248_v0 = vmov 0.0   ;;  %vm249_vm0 = vmmov 0   ;;  %v192_v1 = vld [vmem:[#allocation5 + $0x18] sm:$0xff]   ;;  %v193_v2 = vld [vmem:[#allocation5 + $0x10] sm:$0xff]   ;;  %v147_v17 = vstv %s302_s4 }
  0x1a   :  { %174 = vmatprep.subr.bf16.mxu0 %v248_v0  ;;  %182 = vmatprep.mubr.msk.bf16.mxu0 %vm249_vm0, %v248_v0  ;;  %v194_v3 = vld [vmem:[#allocation5 + $0x8] sm:$0xff]   ;;  %v195_v4 = vld [vmem:[#allocation5] sm:$0xff]   ;;  %v48_v5 = vld [vmem:[#allocation3] sm:$0xff]  ;;  %vm89_vm1 = vcmask 523264   ;;  %vm154_vm3 = vcmask 7168  }
  0x1b   :  { %175 = vmatpush3.bf16.msra.mxu0 %v192_v1  ;;  %v49_v6 = vpack.c.bf16 %v48_v5, %v48_v5  ;;  %v162_v7 = vld [vmem:[%s300_s2] ss:$0 sm:$0xff] }
  0x1c   :  { %176 = vmatprep.subr.bf16.mxu0 %v248_v0  ;;  %v168_v12 = vld [vmem:[%s301_s3] ss:$0 sm:$0xff] }
  0x1f   :  { %177 = vmatpush3.bf16.msra.mxu0 %v193_v2 }
  0x20   :  { %178 = vmatprep.subr.bf16.mxu0 %v248_v0 }
  0x23   :  { %179 = vmatpush3.bf16.msra.mxu0 %v194_v3 }
  0x24   :  { %180 = vmatprep.subr.bf16.mxu0 %v248_v0 }
  0x27   :  { %181 = vmatpush3.bf16.msra.mxu0 %v195_v4 }
  0x2a   :  { %183 = vmatmul.mubr.msk.bf16.vlgmr.msra.gmra.mxu0 %vm89_vm1, %v49_v6 }
  0xea   :  { %v127_v8 = vpop.f32.mrf.mxu0 }
  0xeb   :  { %v128_v9 = vadd.f32 %v162_v7, %v127_v8 }
  0xec   :  { %v184_v10 = vpop.f32.mrf.mxu0 }
  0xed   :  { %v134_v11 = vmul.f32 0.01, %v128_v9  ;;  %vm133_vm2 = vcmp.gt.f32.partialorder %v128_v9, 0.0 }
  0xee   :  { %v130_v13 = vpop.f32.mrf.mxu0 }
  0xef   :  { %v135_v14 = vsel %vm133_vm2, %v128_v9, %v134_v11 }
  0xf0   :  { %v185_v15 = vpop.f32.mrf.mxu0  ;;  %v143_v16 = vmul.f32 %v168_v12, %v135_v14 }
  0xf2   :  { %144 = vadd.xlane.f32.xlu0 %v143_v16 }
 0x17b   :  { %v145_v18 = vpop.xlane.xlu0 %144 }
 0x17c   :  { %v148_v19 = vadd.f32 %v147_v17, %v145_v18 }
 0x17e   :  { %v149_v20 = vsub.f32 0.0, %v148_v19 }
 0x180   :  { %v150_v21 = vmul.f32 1.442695, %v149_v20 }
 0x182   :  { %196 = vpow2.f32 %v150_v21 }
 0x18f   :  { %v197_v22 = vpop.eup %196 }
 0x190   :  { %v152_v23 = vadd.f32 1.0, %v197_v22 }
 0x192   :  { %198 = vrcp.f32 %v152_v23 }
 0x19f   :  { %v199_v24 = vpop.eup %198 }
 0x1a0   :  { %155 = vst.msk [vmem:[%s303_s5] sm:$0xff] %vm154_vm3, %v199_v24 }
 0x1a1   :  { %160 = vsyncpa [#allocation4], 1 }
 0x1a2   :  { %161 = vsyncpa [#allocation6], 1 }

// kernel: tpu_custom_call.1
= control target key start
LH: loop header
LB: loop body
LE: loop exit
PB: predicated region body
PF: predicated region fallthrough
CT: control target
= control target key end

     0   :  { %11 = vsyncpa [#allocation4], 0  ;;  %s298_s0 = inlined_call_operand.hbm [shape: f32[8,64], index: 0, kind: input, shape index: {}]   ;;  %s299_s1 = inlined_call_operand.hbm [shape: bf16[64,128], index: 1, kind: input, shape index: {}]   ;;  %s300_s2 = inlined_call_operand.vmem [shape: f32[1,128], index: 2, kind: input, shape index: {}]   ;;  %s301_s3 = inlined_call_operand.vmem [shape: f32[1,128], index: 3, kind: input, shape index: {}]   ;;  %s302_s4 = inlined_call_operand.<no memory space> [shape: f32[1,1], index: 4, kind: input, shape index: {}]   ;;  %s303_s5 = inlined_call_operand.vmem [shape: f32[8,1], index: 5, kind: output, shape index: {}]  }
   0x1   :  { %12 = vsyncpa [#allocation6], 0  ;;  %s244_s18 = smov [#allocation3]   ;;  %s245_s20 = smov [#allocation5]  }
   0x2   :  { %s19_s19 = sshll.u32 %s244_s18, 4  ;;  %s28_s21 = sshll.u32 %s245_s20, 4  ;;  %s20_s19 = int_to_ptr.vmem [resolvable:$true] %s19_s19  ;;  %s29_s21 = int_to_ptr.vmem [resolvable:$true] %s28_s21 }
   0x3   :  { %s208_s22 = scalar_lea.vmem %s20_s19, 128  ;;  %p213_p1 = scmp.lt.s32.totalorder %s20_s19, %s20_s19 }
   0x4   :  { %p209_p0 = scmp.ne.s32.totalorder %s20_s19, %s208_s22  ;;  %p214_p2 = scmp.lt.s32.totalorder %s208_s22, %s208_s22 }
   0x6   :  { %p215_p3 = por %p214_p2, %p213_p1 }
   0x8   :  { %p216_p4 = pnand %p215_p3, %p209_p0 }
   0xa   :  { %219 = shalt.err (!%p216_p4)
}
   0xb   :  { %22 = dma.hbm_to_vmem [thread:$0]  %s298_s0, 128, %s20_s19, [#allocation4]  }
   0xc   :  { %s228_s25 = scalar_lea.vmem %s29_s21, 512  ;;  %p233_p6 = scmp.lt.s32.totalorder %s29_s21, %s29_s21 }
   0xd   :  { %p229_p5 = scmp.ne.s32.totalorder %s29_s21, %s228_s25  ;;  %p234_p7 = scmp.lt.s32.totalorder %s228_s25, %s228_s25 }
   0xf   :  { %p235_p8 = por %p234_p7, %p233_p6 }
  0x11   :  { %p236_p9 = pnand %p235_p8, %p229_p5 }
  0x13   :  { %239 = shalt.err (!%p236_p9)
}
  0x14   :  { %s246_s26 = smov 64   ;;  %s247_s27 = smov 4  }
  0x15   :  { %34 = dma.hbm_to_vmem [thread:$0]  %s299_s1, 512, %s29_s21, [#allocation6], %s246_s26, %s246_s26, %s247_s27  }
  0x16   :  { %240 = dma.done.wait [#allocation4], 128  }
  0x17   :  { %241 = vsyncadd [#allocation4], 4294967168 }
  0x18   :  { %242 = dma.done.wait [#allocation6], 512  }
  0x19   :  { %243 = vsyncadd [#allocation6], 4294966784  ;;  %v248_v0 = vmov 0.0   ;;  %vm249_vm0 = vmmov 0   ;;  %v192_v1 = vld [vmem:[#allocation5 + $0x18] sm:$0xff]   ;;  %v193_v2 = vld [vmem:[#allocation5 + $0x10] sm:$0xff]   ;;  %v147_v17 = vstv %s302_s4 }
  0x1a   :  { %174 = vmatprep.subr.bf16.mxu0 %v248_v0  ;;  %182 = vmatprep.mubr.msk.bf16.mxu0 %vm249_vm0, %v248_v0  ;;  %v194_v3 = vld [vmem:[#allocation5 + $0x8] sm:$0xff]   ;;  %v195_v4 = vld [vmem:[#allocation5] sm:$0xff]   ;;  %v48_v5 = vld [vmem:[#allocation3] sm:$0xff]  ;;  %vm89_vm1 = vcmask 523264   ;;  %vm154_vm3 = vcmask 7168  }
  0x1b   :  { %175 = vmatpush3.bf16.msra.mxu0 %v192_v1  ;;  %v49_v6 = vpack.c.bf16 %v48_v5, %v48_v5  ;;  %v162_v7 = vld [vmem:[%s300_s2] ss:$0 sm:$0xff] }
  0x1c   :  { %176 = vmatprep.subr.bf16.mxu0 %v248_v0  ;;  %v168_v12 = vld [vmem:[%s301_s3] ss:$0 sm:$0xff] }
  0x1f   :  { %177 = vmatpush3.bf16.msra.mxu0 %v193_v2 }
  0x20   :  { %178 = vmatprep.subr.bf16.mxu0 %v248_v0 }
  0x23   :  { %179 = vmatpush3.bf16.msra.mxu0 %v194_v3 }
  0x24   :  { %180 = vmatprep.subr.bf16.mxu0 %v248_v0 }
  0x27   :  { %181 = vmatpush3.bf16.msra.mxu0 %v195_v4 }
  0x2a   :  { %183 = vmatmul.mubr.msk.bf16.vlgmr.msra.gmra.mxu0 %vm89_vm1, %v49_v6 }
  0xea   :  { %v127_v8 = vpop.f32.mrf.mxu0 }
  0xeb   :  { %v128_v9 = vadd.f32 %v162_v7, %v127_v8 }
  0xec   :  { %v184_v10 = vpop.f32.mrf.mxu0 }
  0xed   :  { %v134_v11 = vmul.f32 0.01, %v128_v9  ;;  %vm133_vm2 = vcmp.gt.f32.partialorder %v128_v9, 0.0 }
  0xee   :  { %v130_v13 = vpop.f32.mrf.mxu0 }
  0xef   :  { %v135_v14 = vsel %vm133_vm2, %v128_v9, %v134_v11 }
  0xf0   :  { %v185_v15 = vpop.f32.mrf.mxu0  ;;  %v143_v16 = vmul.f32 %v168_v12, %v135_v14 }
  0xf2   :  { %144 = vadd.xlane.f32.xlu0 %v143_v16 }
 0x17b   :  { %v145_v18 = vpop.xlane.xlu0 %144 }
 0x17c   :  { %v148_v19 = vadd.f32 %v147_v17, %v145_v18 }
 0x17e   :  { %v149_v20 = vsub.f32 0.0, %v148_v19 }
 0x180   :  { %v150_v21 = vmul.f32 1.442695, %v149_v20 }
 0x182   :  { %196 = vpow2.f32 %v150_v21 }
 0x18f   :  { %v197_v22 = vpop.eup %196 }
 0x190   :  { %v152_v23 = vadd.f32 1.0, %v197_v22 }
 0x192   :  { %198 = vrcp.f32 %v152_v23 }
 0x19f   :  { %v199_v24 = vpop.eup %198 }
 0x1a0   :  { %155 = vst.msk [vmem:[%s303_s5] sm:$0xff] %vm154_vm3, %v199_v24 }
 0x1a1   :  { %160 = vsyncpa [#allocation4], 1 }
 0x1a2   :  { %161 = vsyncpa [#allocation6], 1 }

</bundles_post_ra>
